<compile_context>
chip_gen: v5e
topology: v5e:2x2
jax: 0.10.0
libtpu: 0.0.40
codegen_flags: <defaults>
</compile_context>

<pallas_src>
import math
from functools import partial

import jax
import jax.numpy as jnp
from jax.experimental import pallas as pl
from jax.experimental.pallas import tpu as pltpu


def _pos_emb_kernel(pos_ref, freq_ref, phase_ref, out_ref, *, fast):
    """One row tile.

    pos_ref:   (TN, 1)       f32 positions
    freq_ref:  (1, d_model)  f32 per-channel frequency (turns/unit if fast, rad/unit otherwise)
    phase_ref: (1, d_model)  f32 per-channel phase (0 / 0.25 turns, or 0 / pi/2 rad)
    out_ref:   (TN, d_model) f32

    out[n, j] = cos(pos[n] * scale * div_term[j//2] - phase[j])
              = cos(angle) for even j, sin(angle) for odd j.
    """
    if fast:
        # Angle in turns; reduce to t in [-0.5, 0.5] (exact subtraction), then
        # cos(2*pi*t) = 1 - 2*sin(pi*t)^2 with a degree-9 sin polynomial.
        y = pos_ref[...] * freq_ref[...] - phase_ref[...]
        k = jnp.floor(y + 0.5)
        t = y - k                                   # exact (Sterbenz), |t| <= 0.5
        h = t * jnp.float32(math.pi)                # half-angle in [-pi/2, pi/2]
        h2 = h * h
        p = jnp.float32(1.0 / 362880.0)
        p = p * h2 + jnp.float32(-1.0 / 5040.0)
        p = p * h2 + jnp.float32(1.0 / 120.0)
        p = p * h2 + jnp.float32(-1.0 / 6.0)
        p = p * h2 + jnp.float32(1.0)
        s = h * p                                   # sin(h), |err| ~ 4e-6
        out = 1.0 - 2.0 * (s * s)                   # cos(2*pi*(y - k))
    else:
        out = jnp.cos(pos_ref[...] * freq_ref[...] - phase_ref[...])
    out_ref[...] = out.astype(out_ref.dtype)


def _vmem_budget():
    """(per-tile VMEM budget, vmem_limit_bytes) gated on the TPU generation."""
    try:
        info = pltpu.get_tpu_info()
        cap = int(getattr(info, "vmem_capacity_bytes", 64 * 1024 * 1024))
    except Exception:  # be conservative if the query is unavailable
        cap = 64 * 1024 * 1024
    if cap >= 100 * 1024 * 1024:                    # v5e / v6e: 128 MiB physical
        return 8 * 1024 * 1024, 64 * 1024 * 1024
    return 4 * 1024 * 1024, 32 * 1024 * 1024        # v7x: 64 MiB per TensorCore


def _choose_row_tile(n_rows, d_model, budget_bytes):
    """Rows per block.

    Accounts for the lane-padded VMEM footprint of both the (TN, d_model) f32
    output block and the (TN, 1) f32 pos block (which lane-pads to a full
    128-lane tile -> 512 B/row), each double-buffered.
    """
    d_lanes = -(-d_model // 128) * 128
    bytes_per_row = 2 * (4 * d_lanes + 512)         # 2x double-buffered
    max_rows = max(8, budget_bytes // bytes_per_row)
    if n_rows <= max_rows:
        return n_rows                                # single/whole-extent blocks are legal
    return (max_rows // 8) * 8                       # multiple of 8; ragged tail via cdiv grid


def pos_embedding_sinusoidal(pos, d_model, scale_factor=5000.0, *,
                             use_fast_cos=True, out_dtype=jnp.float32):
    """JAX/Pallas equivalent of PosEmbeddingSinuosidal.forward.

    pos: (B, S) float array.  returns: (B, S, d_model) `out_dtype`.
    """
    assert d_model % 2 == 0, "d_model must be even"
    B, S = pos.shape
    N = B * S

    # div_term exactly as the PyTorch module builds it.  NOTE: the module
    # hard-codes log(5000.0) regardless of scale_factor; mirrored on purpose.
    ks = jnp.arange(0, d_model, 2, dtype=jnp.float32)
    div_term = jnp.exp(ks * jnp.float32(-math.log(5000.0) / d_model))   # (d_model//2,)
    div_full = jnp.repeat(div_term, 2)                                  # channel j -> div_term[j//2]

    if use_fast_cos:
        # Work in turns: fold scale_factor/(2*pi) into the table; phase is a quarter turn.
        freq = div_full * jnp.float32(scale_factor / (2.0 * math.pi))
        phase = jnp.tile(jnp.asarray([0.0, 0.25], jnp.float32), d_model // 2)
    else:
        freq = div_full * jnp.float32(scale_factor)
        phase = jnp.tile(jnp.asarray([0.0, math.pi / 2.0], jnp.float32), d_model // 2)

    freq = freq.reshape(1, d_model)
    phase = phase.reshape(1, d_model)
    pos2 = pos.astype(jnp.float32).reshape(N, 1)     # metadata-only reshape

    tile_budget, vmem_limit = _vmem_budget()
    TN = _choose_row_tile(N, d_model, tile_budget)
    grid = (pl.cdiv(N, TN),)                         # ragged last tile handled by Pallas

    out = pl.pallas_call(
        partial(_pos_emb_kernel, fast=use_fast_cos),
        out_shape=jax.ShapeDtypeStruct((N, d_model), out_dtype),
        grid=grid,
        in_specs=[
            pl.BlockSpec((TN, 1), lambda i: (i, 0)),          # pos rows
            pl.BlockSpec((1, d_model), lambda i: (0, 0)),     # freq table (resident)
            pl.BlockSpec((1, d_model), lambda i: (0, 0)),     # phase table (resident)
        ],
        out_specs=pl.BlockSpec((TN, d_model), lambda i: (i, 0)),
        compiler_params=pltpu.CompilerParams(
            # Single flattened row axis, every tile independent -> megacore can
            # split it evenly across both TensorCores on v7x regardless of B.
            dimension_semantics=("parallel",),
            vmem_limit_bytes=vmem_limit,
        ),
    )(pos2, freq, phase)

    return out.reshape(B, S, d_model)                # metadata-only reshape


def _reference(pos, d_model, scale_factor=5000.0):
    """Pure-JAX reference mirroring the PyTorch forward literally."""
    k = jnp.arange(0, d_model, 2, dtype=jnp.float32)
    div_term = jnp.exp(k * (-math.log(5000.0) / d_model))
    p = pos.astype(jnp.float32) * scale_factor
    ang = p[:, :, None] * div_term[None, None, :]
    y = jnp.zeros((*pos.shape, d_model), dtype=jnp.float32)
    y = y.at[:, :, ::2].set(jnp.cos(ang))
    y = y.at[:, :, 1::2].set(jnp.sin(ang))
    return y


if __name__ == "__main__":
    B, S, d_model = 2, 8, 32
    key = jax.random.PRNGKey(0)
    pos = jax.random.uniform(key, (B, S), dtype=jnp.float32)   # positions in [0, 1)

    ref = _reference(pos, d_model)

    # Fast path (default): turns-based reduction + polynomial cos.
    out_fast = jax.block_until_ready(pos_embedding_sinusoidal(pos, d_model))
    assert out_fast.shape == (B, S, d_model)
    assert out_fast.dtype == jnp.float32
    # Angle ordering (scale folded into the table) and the polynomial path
    # differ from the literal PyTorch-order f32 evaluation by up to ~1e-3 at
    # |angle| ~ 5e3 — both are equally valid f32 results.
    assert jnp.allclose(out_fast, ref, atol=5e-3, rtol=0.0)

    # Plain jnp.cos path for cross-checking.
    out_ref_cos = jax.block_until_ready(
        pos_embedding_sinusoidal(pos, d_model, use_fast_cos=False))
    assert jnp.allclose(out_ref_cos, ref, atol=5e-3, rtol=0.0)

    print("KERNEL_OK")
</pallas_src>

<mosaic_0001>
module attributes {stable_mosaic.version = 11 : i64} {
  func.func @_pos_emb_kernel(%arg0: i32, %arg1: memref<16x1xf32, #tpu.memory_space<vmem>>, %arg2: memref<1x32xf32, #tpu.memory_space<vmem>>, %arg3: memref<1x32xf32, #tpu.memory_space<vmem>>, %arg4: memref<16x32xf32, #tpu.memory_space<vmem>>) attributes {dimension_semantics = [#tpu.dimension_semantics<parallel>], iteration_bounds = array<i64: 1>, scalar_prefetch = 0 : i64, scratch_operands = 0 : i64, tpu.core_type = #tpu.core_type<tc>, window_params = [{transform_indices = @transform_0, window_bounds = array<i64: 16, 1>}, {pipeline_mode = #tpu.pipeline_mode<synchronous>, transform_indices = @transform_1, window_bounds = array<i64: 1, 32>}, {pipeline_mode = #tpu.pipeline_mode<synchronous>, transform_indices = @transform_2, window_bounds = array<i64: 1, 32>}, {transform_indices = @transform_3, window_bounds = array<i64: 16, 32>}]} {
    %c0 = arith.constant 0 : index
    %c0_0 = arith.constant 0 : index
    %0 = vector.load %arg1[%c0, %c0_0] : memref<16x1xf32, #tpu.memory_space<vmem>>, vector<16x1xf32>
    %c0_1 = arith.constant 0 : index
    %c0_2 = arith.constant 0 : index
    %1 = vector.load %arg2[%c0_1, %c0_2] : memref<1x32xf32, #tpu.memory_space<vmem>>, vector<1x32xf32>
    %2 = vector.broadcast %0 : vector<16x1xf32> to vector<16x32xf32>
    %3 = vector.broadcast %1 : vector<1x32xf32> to vector<16x32xf32>
    %4 = arith.mulf %2, %3 : vector<16x32xf32>
    %c0_3 = arith.constant 0 : index
    %c0_4 = arith.constant 0 : index
    %5 = vector.load %arg3[%c0_3, %c0_4] : memref<1x32xf32, #tpu.memory_space<vmem>>, vector<1x32xf32>
    %6 = vector.broadcast %5 : vector<1x32xf32> to vector<16x32xf32>
    %7 = arith.subf %4, %6 : vector<16x32xf32>
    %cst = arith.constant 5.000000e-01 : f32
    %8 = vector.broadcast %cst : f32 to vector<16x32xf32>
    %9 = arith.addf %7, %8 : vector<16x32xf32>
    %10 = math.floor %9 : vector<16x32xf32>
    %11 = arith.subf %7, %10 : vector<16x32xf32>
    %cst_5 = arith.constant 3.14159274 : f32
    %12 = vector.broadcast %cst_5 : f32 to vector<16x32xf32>
    %13 = arith.mulf %11, %12 : vector<16x32xf32>
    %14 = arith.mulf %13, %13 : vector<16x32xf32>
    %cst_6 = arith.constant 2.75573188E-6 : f32
    %15 = vector.broadcast %cst_6 : f32 to vector<16x32xf32>
    %16 = arith.mulf %15, %14 : vector<16x32xf32>
    %cst_7 = arith.constant -1.98412701E-4 : f32
    %17 = vector.broadcast %cst_7 : f32 to vector<16x32xf32>
    %18 = arith.addf %16, %17 : vector<16x32xf32>
    %19 = arith.mulf %18, %14 : vector<16x32xf32>
    %cst_8 = arith.constant 0.00833333377 : f32
    %20 = vector.broadcast %cst_8 : f32 to vector<16x32xf32>
    %21 = arith.addf %19, %20 : vector<16x32xf32>
    %22 = arith.mulf %21, %14 : vector<16x32xf32>
    %cst_9 = arith.constant -0.166666672 : f32
    %23 = vector.broadcast %cst_9 : f32 to vector<16x32xf32>
    %24 = arith.addf %22, %23 : vector<16x32xf32>
    %25 = arith.mulf %24, %14 : vector<16x32xf32>
    %cst_10 = arith.constant 1.000000e+00 : f32
    %26 = vector.broadcast %cst_10 : f32 to vector<16x32xf32>
    %27 = arith.addf %25, %26 : vector<16x32xf32>
    %28 = arith.mulf %13, %27 : vector<16x32xf32>
    %29 = arith.mulf %28, %28 : vector<16x32xf32>
    %cst_11 = arith.constant 2.000000e+00 : f32
    %30 = vector.broadcast %cst_11 : f32 to vector<16x32xf32>
    %31 = arith.mulf %30, %29 : vector<16x32xf32>
    %cst_12 = arith.constant 1.000000e+00 : f32
    %32 = vector.broadcast %cst_12 : f32 to vector<16x32xf32>
    %33 = arith.subf %32, %31 : vector<16x32xf32>
    %c0_13 = arith.constant 0 : index
    %c0_14 = arith.constant 0 : index
    %34 = vector.load %arg4[%c0_13, %c0_14] : memref<16x32xf32, #tpu.memory_space<vmem>>, vector<16x32xf32>
    tpu.vector_store %arg4[%c0_13, %c0_14], %33 {strides = array<i32>} : memref<16x32xf32, #tpu.memory_space<vmem>>, vector<16x32xf32>,
    return
  }
  func.func @transform_0(%arg0: i32) -> (i32, i32) {
    %c0_i32 = arith.constant 0 : i32
    %c0_i32_0 = arith.constant 0 : i32
    return %arg0, %c0_i32 : i32, i32
  }
  func.func @transform_1(%arg0: i32) -> (i32, i32) {
    %c0_i32 = arith.constant 0 : i32
    %c0_i32_0 = arith.constant 0 : i32
    %c0_i32_1 = arith.constant 0 : i32
    return %c0_i32, %c0_i32_0 : i32, i32
  }
  func.func @transform_2(%arg0: i32) -> (i32, i32) {
    %c0_i32 = arith.constant 0 : i32
    %c0_i32_0 = arith.constant 0 : i32
    %c0_i32_1 = arith.constant 0 : i32
    return %c0_i32, %c0_i32_0 : i32, i32
  }
  func.func @transform_3(%arg0: i32) -> (i32, i32) {
    %c0_i32 = arith.constant 0 : i32
    %c0_i32_0 = arith.constant 0 : i32
    return %arg0, %c0_i32 : i32, i32
  }
}

</mosaic_0001>

<bundles_post_ra>
// kernel: tpu_custom_call.1
= control target key start
LH: loop header
LB: loop body
LE: loop exit
PB: predicated region body
PF: predicated region fallthrough
CT: control target
= control target key end

     0   :  { %v127_v1 = vmov 0   ;;  %s166_s0 = inlined_call_operand.vmem [shape: f32[16,1], index: 0, kind: input, shape index: {}]   ;;  %s167_s1 = inlined_call_operand.vmem [shape: f32[1,32], index: 1, kind: input, shape index: {}]   ;;  %s168_s2 = inlined_call_operand.vmem [shape: f32[1,32], index: 2, kind: input, shape index: {}]   ;;  %s169_s3 = inlined_call_operand.hbm [shape: f32[16,32], index: 3, kind: output, shape index: {}]  }
   0x1   :  { %v15_v0 = vld [vmem:[%s166_s0] sm:$0xff]  ;;  %98 = vset.pattern.permute.xlu0 %v127_v1 }
   0x2   :  { %20 = vperm.xlu0 %98, %v15_v0  }
   0x3   :  { %8 = vsyncpa [#allocation3], 0  ;;  %v16_v2 = vld [vmem:[%s166_s0 + $0x8] sm:$0xff]  ;;  %v99_v3 = vld [vmem:[%s167_s1] ss:$0 sm:$0xff]  ;;  %vm73_vm0 = vcmask 261120  }
   0x4   :  { %v100_v4 = vld [vmem:[%s168_s2] ss:$0 sm:$0xff]  ;;  %s128_s0 = smov [#allocation2]   ;;  %s82_s21 = sshll.u32 %s169_s3, 4  ;;  %s83_s21 = int_to_ptr.hbm [resolvable:$true] %s82_s21 }
   0x5   :  { %s80_s1 = sshll.u32 %s128_s0, 4  ;;  %s129_s22 = smov 128   ;;  %s81_s1 = int_to_ptr.vmem [resolvable:$true] %s80_s1 }
   0x6   :  { %s130_s23 = smov 8  }
   0xa   :  { %25 = vperm.xlu0 %98, %v16_v2  }
  0x74   :  { %v21_v5 = vpop.permute.xlu0 %20 }
  0x75   :  { %v31_v6 = vmul.f32 %v99_v3, %v21_v5 }
  0x77   :  { %v37_v7 = vsub.f32 %v31_v6, %v100_v4 }
  0x79   :  { %v39_v8 = vadd.f32 0.5, %v37_v7 }
  0x7b   :  { %v41_v9 = vfloor.f32 %v39_v8 }
  0x7c   :  { %v26_v10 = vpop.permute.xlu0 %25 }
  0x7d   :  { %v43_v11 = vsub.f32 %v37_v7, %v41_v9  ;;  %v32_v12 = vmul.f32 %v99_v3, %v26_v10 }
  0x7f   :  { %v45_v13 = vmul.f32 3.1415927, %v43_v11  ;;  %v38_v14 = vsub.f32 %v32_v12, %v100_v4 }
  0x81   :  { %v47_v15 = vmul.f32 %v45_v13, %v45_v13  ;;  %v40_v16 = vadd.f32 0.5, %v38_v14 }
  0x83   :  { %v49_v17 = vmul.f32 2.7557319e-06, %v47_v15  ;;  %v42_v18 = vfloor.f32 %v40_v16 }
  0x85   :  { %v51_v19 = vadd.f32 -0.0001984127, %v49_v17  ;;  %v44_v20 = vsub.f32 %v38_v14, %v42_v18 }
  0x87   :  { %v53_v21 = vmul.f32 %v51_v19, %v47_v15  ;;  %v46_v22 = vmul.f32 3.1415927, %v44_v20 }
  0x89   :  { %v55_v23 = vadd.f32 0.008333334, %v53_v21  ;;  %v48_v24 = vmul.f32 %v46_v22, %v46_v22 }
  0x8b   :  { %v57_v25 = vmul.f32 %v55_v23, %v47_v15  ;;  %v50_v26 = vmul.f32 2.7557319e-06, %v48_v24 }
  0x8d   :  { %v59_v27 = vadd.f32 -0.16666667, %v57_v25  ;;  %v52_v28 = vadd.f32 -0.0001984127, %v50_v26 }
  0x8f   :  { %v61_v29 = vmul.f32 %v59_v27, %v47_v15  ;;  %v54_v30 = vmul.f32 %v52_v28, %v48_v24 }
  0x91   :  { %v63_v31 = vadd.f32 1.0, %v61_v29  ;;  %v56_v32 = vadd.f32 0.008333334, %v54_v30 }
  0x93   :  { %v65_v33 = vmul.f32 %v63_v31, %v45_v13  ;;  %v58_v34 = vmul.f32 %v56_v32, %v48_v24 }
  0x95   :  { %v67_v35 = vmul.f32 %v65_v33, %v65_v33  ;;  %v60_v36 = vadd.f32 -0.16666667, %v58_v34 }
  0x97   :  { %v69_v37 = vmul.f32 2.0, %v67_v35  ;;  %v62_v38 = vmul.f32 %v60_v36, %v48_v24 }
  0x99   :  { %v71_v39 = vsub.f32 1.0, %v69_v37  ;;  %v64_v40 = vadd.f32 1.0, %v62_v38 }
  0x9b   :  { %74 = vst.msk [vmem:[#allocation2] sm:$0xff] %vm73_vm0, %v71_v39  ;;  %v66_v41 = vmul.f32 %v64_v40, %v46_v22 }
  0x9d   :  { %v68_v42 = vmul.f32 %v66_v41, %v66_v41 }
  0x9f   :  { %v70_v43 = vmul.f32 2.0, %v68_v42 }
  0xa1   :  { %v72_v44 = vsub.f32 1.0, %v70_v43 }
  0xa3   :  { %75 = vst.msk [vmem:[#allocation2 + $0x8] sm:$0xff] %vm73_vm0, %v72_v44 }
  0xa4   :  { %88 = dma.vmem_to_hbm [thread:$0]  %s81_s1, 256, %s83_s21, [#allocation3], %s129_s22, %s129_s22, %s130_s23  }
  0xa5   :  { %125 = dma.done.wait [#allocation3], 256  }
  0xa6   :  { %126 = vsyncadd [#allocation3], 4294967040 }
  0xa7   :  { %93 = vsyncpa [#allocation3], 1 }

</bundles_post_ra>
